<compile_context>
chip_gen: v7x
topology: tpu7x:2x2x1
jax: 0.10.0
libtpu: 0.0.40
codegen_flags: <defaults>
</compile_context>

<pallas_src>
import jax
import jax.numpy as jnp
import numpy as np
from jax import lax
from jax.experimental import pallas as pl
from jax.experimental.pallas import tpu as pltpu

EPS = 1e-5          # BatchNorm eps (PyTorch default)
NEG_SLOPE = 0.2     # LeakyReLU negative slope


def down_kernel(p_ref, w_ref, scale_ref, shift_ref, o_ref):
    # p_ref:     (1, K, TT)     bf16 im2col patches (K on sublanes, time on lanes)
    # w_ref:     (N_pad, K)     bf16 conv weight (resident)
    # scale_ref: (N_pad, 1)     f32  BN scale  = gamma * rsqrt(var + eps)
    # shift_ref: (N_pad, 1)     f32  BN shift  = beta - mean * scale
    # o_ref:     (1, N_pad, TT) f32  lane-dense along time
    acc = jnp.dot(w_ref[...], p_ref[0],
                  preferred_element_type=jnp.float32)          # (N_pad, TT), MXU, f32 acc
    y = acc * scale_ref[...] + shift_ref[...]                  # f32 epilogue (VPU)
    o_ref[0, :, :] = jnp.where(y >= 0.0, y, NEG_SLOPE * y).astype(o_ref.dtype)


def _round_up(x, m):
    return (x + m - 1) // m * m


def _pick_time_tile(l_out, k, n_pad, batch, vmem_budget=10 * 1024 * 1024):
    """Pick the time-tile (lane) size: minimise padding waste under a VMEM budget that fits
    the default scoped VMEM on every TPU generation (v5e 16 MiB, v6e 32 MiB, v7x 32 MiB)."""
    if l_out <= 128:
        return l_out                       # single full-extent tile (block dim == array dim)

    def vmem_est(tt):
        return (2 * k * tt * 2             # double-buffered bf16 patch tile
                + 2 * n_pad * tt * 4       # double-buffered f32 output tile
                + 2 * n_pad * k * 2        # resident bf16 weight (2 bufs)
                + 4 * n_pad * 4)           # BN scale/shift

    best = None
    for tt in (1024, 512, 256, 128):
        if vmem_est(tt) > vmem_budget:
            continue
        n_tiles = -(-l_out // tt)
        if batch == 1 and l_out > 256 and n_tiles < 2:
            continue                       # keep >=2 grid steps so both v7x cores get work
        waste = (-l_out) % tt
        if best is None or waste < best[0] or (waste == best[0] and tt > best[1]):
            best = (waste, tt)
    return best[1] if best is not None else 128


def down_forward(x_ncl, params, ds):
    """x_ncl: (B, C_in, L) float32.  Returns (B, C_out, L_out) float32."""
    w = params["w"]                        # (C_out, C_in, ks)  PyTorch Conv1d layout
    gamma, beta = params["gamma"], params["beta"]
    mean, var = params["mean"], params["var"]

    B, C_in, L = x_ncl.shape
    C_out, _, ks = w.shape
    assert ks == ds + 1
    pad = ks // 2
    assert L > pad, "ReflectionPad1d requires L > pad"

    # --- ReflectionPad1d + im2col (wrapper-side layout plumbing), built transposed so the
    #     long time axis lands on the lane dimension and K is never lane-padded ---
    xp = jnp.pad(x_ncl.astype(jnp.float32), ((0, 0), (0, 0), (pad, pad)), mode="reflect")
    Lp = L + 2 * pad
    L_out = (Lp - ks) // ds + 1
    idx = jnp.arange(ks)[:, None] + jnp.arange(L_out)[None, :] * ds       # (ks, L_out)
    patches = xp[:, :, idx]                                               # (B, C_in, ks, L_out)
    patches = patches.reshape(B, C_in * ks, L_out).astype(jnp.bfloat16)   # (B, K, L_out)

    # --- eval-mode BatchNorm as f32 per-channel scale/shift (applied in the kernel epilogue,
    #     NOT folded into the bf16 weights) ---
    scale = (gamma * lax.rsqrt(var + EPS)).astype(jnp.float32)            # (C_out,)
    shift = (beta - mean * scale).astype(jnp.float32)                     # (C_out,)

    K = C_in * ks
    N_pad = _round_up(C_out, 8)            # sublane-only channel padding (no 128-lane pad)
    TT = _pick_time_tile(L_out, K, N_pad, B)
    L_out_pad = _round_up(L_out, TT)

    patches = jnp.pad(patches, ((0, 0), (0, 0), (0, L_out_pad - L_out)))
    w_mat = jnp.pad(w.reshape(C_out, K),
                    ((0, N_pad - C_out), (0, 0))).astype(jnp.bfloat16)    # (N_pad, K)
    scale_col = jnp.pad(scale[:, None], ((0, N_pad - C_out), (0, 0)))     # (N_pad, 1)
    shift_col = jnp.pad(shift[:, None], ((0, N_pad - C_out), (0, 0)))     # (N_pad, 1)

    out = pl.pallas_call(
        down_kernel,
        out_shape=jax.ShapeDtypeStruct((B, N_pad, L_out_pad), jnp.float32),
        grid=(B, L_out_pad // TT),
        in_specs=[
            pl.BlockSpec((1, K, TT), lambda b, t: (b, 0, t)),      # patch tile
            pl.BlockSpec((N_pad, K), lambda b, t: (0, 0)),         # resident weight
            pl.BlockSpec((N_pad, 1), lambda b, t: (0, 0)),         # resident BN scale
            pl.BlockSpec((N_pad, 1), lambda b, t: (0, 0)),         # resident BN shift
        ],
        out_specs=pl.BlockSpec((1, N_pad, TT), lambda b, t: (b, 0, t)),
        compiler_params=pltpu.CompilerParams(
            dimension_semantics=("parallel", "parallel")),
    )(patches, w_mat, scale_col, shift_col)

    # Lane axis is already time and channels are already rows -> no final transpose needed.
    return out[:, :C_out, :L_out]


def init_params(key, c_in, c_out, ds):
    ks = ds + 1
    k0, k1, k2, k3, k4 = jax.random.split(key, 5)
    bound = 1.0 / np.sqrt(c_in * ks)
    return {
        "w": jax.random.uniform(k0, (c_out, c_in, ks), jnp.float32, -bound, bound),
        "gamma": jax.random.uniform(k1, (c_out,), jnp.float32, 0.5, 1.5),
        "beta": jax.random.uniform(k2, (c_out,), jnp.float32, -0.5, 0.5),
        "mean": jax.random.uniform(k3, (c_out,), jnp.float32, -0.1, 0.1),
        "var": jax.random.uniform(k4, (c_out,), jnp.float32, 0.5, 1.5),
    }


def reference(x_ncl, params, ds):
    """Pure-JAX f32 reference matching the PyTorch forward (eval-mode BN)."""
    w = params["w"]
    ks = ds + 1
    pad = ks // 2
    xp = jnp.pad(x_ncl, ((0, 0), (0, 0), (pad, pad)), mode="reflect")
    y = lax.conv_general_dilated(
        xp, w, window_strides=(ds,), padding="VALID",
        dimension_numbers=("NCH", "OIH", "NCH"))
    scale = params["gamma"] / jnp.sqrt(params["var"] + EPS)
    shift = params["beta"] - params["mean"] * scale
    y = y * scale[None, :, None] + shift[None, :, None]
    return jnp.where(y >= 0.0, y, NEG_SLOPE * y)


if __name__ == "__main__":
    key = jax.random.PRNGKey(0)
    kx, kp = jax.random.split(key)

    B, C_in, L = 2, 4, 16
    C_out, ds = 8, 2

    x = jax.random.normal(kx, (B, C_in, L), jnp.float32)
    params = init_params(kp, C_in, C_out, ds)

    y = jax.block_until_ready(down_forward(x, params, ds))
    y_ref = reference(x, params, ds)

    assert y.shape == y_ref.shape, (y.shape, y_ref.shape)
    # bf16 matmul inputs with f32 accumulation vs. full-f32 reference.
    np.testing.assert_allclose(np.asarray(y), np.asarray(y_ref), rtol=5e-2, atol=5e-2)
    print("KERNEL_OK")
</pallas_src>

<mosaic_0001>
module attributes {stable_mosaic.version = 11 : i64} {
  func.func @down_kernel(%arg0: i32, %arg1: i32, %arg2: memref<1x12x8xbf16, #tpu.memory_space<vmem>>, %arg3: memref<8x12xbf16, #tpu.memory_space<vmem>>, %arg4: memref<8x1xf32, #tpu.memory_space<vmem>>, %arg5: memref<8x1xf32, #tpu.memory_space<vmem>>, %arg6: memref<1x8x8xf32, #tpu.memory_space<vmem>>) attributes {dimension_semantics = [#tpu.dimension_semantics<parallel>, #tpu.dimension_semantics<parallel>], iteration_bounds = array<i64: 2, 1>, scalar_prefetch = 0 : i64, scratch_operands = 0 : i64, tpu.core_type = #tpu.core_type<tc>, window_params = [{transform_indices = @transform_0, window_bounds = array<i64: 1, 12, 8>}, {pipeline_mode = #tpu.pipeline_mode<synchronous>, transform_indices = @transform_1, window_bounds = array<i64: 8, 12>}, {pipeline_mode = #tpu.pipeline_mode<synchronous>, transform_indices = @transform_2, window_bounds = array<i64: 8, 1>}, {pipeline_mode = #tpu.pipeline_mode<synchronous>, transform_indices = @transform_3, window_bounds = array<i64: 8, 1>}, {transform_indices = @transform_4, window_bounds = array<i64: 1, 8, 8>}]} {
    %c0 = arith.constant 0 : index
    %c0_0 = arith.constant 0 : index
    %0 = vector.load %arg3[%c0, %c0_0] : memref<8x12xbf16, #tpu.memory_space<vmem>>, vector<8x12xbf16>
    %c0_1 = arith.constant 0 : index
    %c0_2 = arith.constant 0 : index
    %c0_3 = arith.constant 0 : index
    %1 = vector.load %arg2[%c0_1, %c0_2, %c0_3] : memref<1x12x8xbf16, #tpu.memory_space<vmem>>, vector<1x12x8xbf16>
    %2 = vector.shape_cast %1 : vector<1x12x8xbf16> to vector<12x8xbf16>
    %cst = arith.constant dense<0.000000e+00> : vector<8x8xf32>
    %3 = tpu.matmul %0, %2, %cst {dimension_numbers = #tpu.dot_dimension_numbers<[1], [0], [0], [1], [0, 0, 1, 1], [], []>} : vector<8x12xbf16>, vector<12x8xbf16>, vector<8x8xf32> -> vector<8x8xf32>
    %c0_4 = arith.constant 0 : index
    %c0_5 = arith.constant 0 : index
    %4 = vector.load %arg4[%c0_4, %c0_5] : memref<8x1xf32, #tpu.memory_space<vmem>>, vector<8x1xf32>
    %5 = vector.broadcast %4 : vector<8x1xf32> to vector<8x8xf32>
    %6 = arith.mulf %3, %5 : vector<8x8xf32>
    %c0_6 = arith.constant 0 : index
    %c0_7 = arith.constant 0 : index
    %7 = vector.load %arg5[%c0_6, %c0_7] : memref<8x1xf32, #tpu.memory_space<vmem>>, vector<8x1xf32>
    %8 = vector.broadcast %7 : vector<8x1xf32> to vector<8x8xf32>
    %9 = arith.addf %6, %8 : vector<8x8xf32>
    %cst_8 = arith.constant 0.000000e+00 : f32
    %10 = vector.broadcast %cst_8 : f32 to vector<8x8xf32>
    %11 = arith.cmpf oge, %9, %10 : vector<8x8xf32>
    %cst_9 = arith.constant 2.000000e-01 : f32
    %12 = vector.broadcast %cst_9 : f32 to vector<8x8xf32>
    %13 = arith.mulf %12, %9 : vector<8x8xf32>
    %14 = arith.select %11, %9, %13 : vector<8x8xi1>, vector<8x8xf32>
    %c0_10 = arith.constant 0 : index
    %c0_11 = arith.constant 0 : index
    %c0_12 = arith.constant 0 : index
    %15 = vector.load %arg6[%c0_10, %c0_11, %c0_12] : memref<1x8x8xf32, #tpu.memory_space<vmem>>, vector<1x8x8xf32>
    %16 = vector.shape_cast %15 : vector<1x8x8xf32> to vector<8x8xf32>
    %17 = vector.shape_cast %14 : vector<8x8xf32> to vector<1x8x8xf32>
    tpu.vector_store %arg6[%c0_10, %c0_11, %c0_12], %17 {strides = array<i32>} : memref<1x8x8xf32, #tpu.memory_space<vmem>>, vector<1x8x8xf32>,
    return
  }
  func.func @transform_0(%arg0: i32, %arg1: i32) -> (i32, i32, i32) {
    %c0_i32 = arith.constant 0 : i32
    %c0_i32_0 = arith.constant 0 : i32
    return %arg0, %c0_i32, %arg1 : i32, i32, i32
  }
  func.func @transform_1(%arg0: i32, %arg1: i32) -> (i32, i32) {
    %c0_i32 = arith.constant 0 : i32
    %c0_i32_0 = arith.constant 0 : i32
    %c0_i32_1 = arith.constant 0 : i32
    return %c0_i32, %c0_i32_0 : i32, i32
  }
  func.func @transform_2(%arg0: i32, %arg1: i32) -> (i32, i32) {
    %c0_i32 = arith.constant 0 : i32
    %c0_i32_0 = arith.constant 0 : i32
    %c0_i32_1 = arith.constant 0 : i32
    return %c0_i32, %c0_i32_0 : i32, i32
  }
  func.func @transform_3(%arg0: i32, %arg1: i32) -> (i32, i32) {
    %c0_i32 = arith.constant 0 : i32
    %c0_i32_0 = arith.constant 0 : i32
    %c0_i32_1 = arith.constant 0 : i32
    return %c0_i32, %c0_i32_0 : i32, i32
  }
  func.func @transform_4(%arg0: i32, %arg1: i32) -> (i32, i32, i32) {
    %c0_i32 = arith.constant 0 : i32
    %c0_i32_0 = arith.constant 0 : i32
    return %arg0, %c0_i32, %arg1 : i32, i32, i32
  }
}

</mosaic_0001>

<bundles_post_ra>
// kernel: tpu_custom_call.1
= control target key start
LH: loop header
LB: loop body
LE: loop exit
PB: predicated region body
PF: predicated region fallthrough
CT: control target
= control target key end

     0   :  { %9 = vsyncpa [#allocation3], 0  ;;  %s699_s0 = inlined_call_operand.vmem [shape: bf16[2,12,8], index: 0, kind: input, shape index: {}]   ;;  %s700_s1 = inlined_call_operand.vmem [shape: bf16[8,12], index: 1, kind: input, shape index: {}]   ;;  %s701_s2 = inlined_call_operand.vmem [shape: f32[8,1], index: 2, kind: input, shape index: {}]   ;;  %s702_s3 = inlined_call_operand.vmem [shape: f32[8,1], index: 3, kind: input, shape index: {}]   ;;  %s703_s4 = inlined_call_operand.hbm [shape: f32[2,8,8], index: 4, kind: output, shape index: {}]  }
   0x1   :  { %11 = vsyncpa [#allocation3 + $0x1], 0  ;;  %s578_s15 = smov 0   ;;  %s580_s16 = smov 0  }
   0x2   :  { %s582_s17 = smov 0   ;;  %s584_s18 = smov 0  }
   0x3   :  { %s586_s19 = smov 0   ;;  %s588_s20 = smov 0  }
   0x4 LB: > { %s386_s21 = sadd.s32 4294967295, %s547_s20   ;;  %s387_s22 = sadd.s32 4294967294, %s547_s20   ;;  %s547_s20 = sphi %s588_s20, %s17_s20   ;;  %s543_s19 = sphi %s586_s19, %s710_s19   ;;  %s539_s18 = sphi %s584_s18, %s709_s18   ;;  %s535_s17 = sphi %s582_s17, %s708_s17   ;;  %s531_s16 = sphi %s580_s16, %s707_s16   ;;  %s527_s15 = sphi %s578_s15, %s706_s15  }
   0x5   : > { %s29_s23 = sadd.s32 1, %s543_s19  ;;  %s129_s24 = sadd.s32 1, %s535_s17 }
   0x6   : > { %p31_p0 = scmp.ge.s32.totalorder %s29_s23, 2  ;;  %p139_p1 = scmp.ne.s32.totalorder %s535_s17, %s531_s16 }
   0x7   : > { %p140_p2 = scmp.eq.s32.totalorder %s386_s21, 1  ;;  %p145_p3 = scmp.ne.s32.totalorder %s531_s16, %s527_s15 }
   0x8   : > { %s712_s23 = smov (%p31_p0, %s29_s23), 0  ;;  %p146_p5 = scmp.eq.s32.totalorder %s387_s22, 1 }
   0x9   : > { %p618_p4 = por %p140_p2, %p139_p1  ;;  %s124_s26 = ssub.s32 %s543_s19, %s712_s23 }
   0xa   : > { %p390_p6 = scmp.ge.s32.totalorder %s547_s20, 1  ;;  %p127_p7 = scmp.eq.s32.totalorder %s124_s26, 0 }
   0xb   : > { %p625_p8 = por %p146_p5, %p145_p3  ;;  %p184_p9 = scmp.lt.s32.totalorder %s547_s20, 3 }
   0xc   : > { %s631_s28 = scalar_select %p127_p7, %s535_s17, %s129_s24  }
   0xd   : > { %p185_p10 = pnand %p390_p6, %p184_p9 }
   0xe   : > { %p213_p11 = scmp.lt.s32.totalorder (!%p185_p10), %s539_s18, 1  ;;  %v549_v0 = vmov (!%p185_p10), 0.0   ;;  %vm550_vm0 = vmmov (!%p185_p10), 0   ;;  %v278_v1 = vld [vmem:[%s701_s2] sm:$0xff] (!%p185_p10)  ;;  %v551_v2 = vmov (!%p185_p10), 0   ;;  %vm234_vm1 = vcmask (!%p185_p10), 1045504  }
   0xf   : > { %188 = sbr.rel (%p185_p10) target bundleno = 264 (0x108), region = 36  ;;  %403 = vmatprep.subr.bf16.mxu0 (!%p185_p10), %v549_v0  ;;  %405 = vmatprep.mubr.msk.bf16.mxu0 (!%p185_p10), %vm550_vm0, %v549_v0  ;;  %v285_v3 = vld [vmem:[%s702_s3] sm:$0xff] (!%p185_p10)  ;;  %vm230_vm2 = vcmask (!%p185_p10), 97280   ;;  %s210_s14 = sand.u32 (!%p185_p10), 1, %s531_s16   ;;  %vm295_vm4 = vcmask (!%p185_p10), 64512  }
  0x10   : > { %467 = vset.pattern.permute.xlu0 (!%p185_p10), %v551_v2  ;;  %v222_v6 = vld [vmem:[%s700_s1] sm:$0xf] (!%p185_p10)  ;;  %s391_s21 = sshll.u32 (!%p185_p10), %s210_s14, 3  ;;  %s397_s22 = sshll.u32 (!%p185_p10), %s539_s18, 7 }
  0x11   : > { %281 = vperm.xlu0 (!%p185_p10), %467, %v278_v1   ;;  %s212_s24 = scalar_lea.vmem (!%p185_p10), [#allocation2], %s391_s21 }
  0x12   : > { %s312_s26 = sshll.u32 (!%p185_p10), %s212_s24, 4  ;;  %s654_s26 = int_to_ptr.vmem [resolvable:$true] %s312_s26 }
  0x13   : > { %s469_s7 = scalar_lea.vmem (!%p185_p10), %s654_s26, 128 }
  0x14   : > { %p470_p12 = scmp.ne.s32.totalorder (!%p185_p10), %s654_s26, %s469_s7 }
  0x15   : > { %288 = vperm.xlu0 (!%p185_p10), %467, %v285_v3  }
  0x16   : > { %s214_s5 = scalar_select %p213_p11, %s539_s18, 1 }
  0x17   : > { %p471_p13 = pnand %p470_p12, %p618_p4  ;;  %s552_s18 = smov [#allocation2]  }
  0x18   : > { %s400_s6 = sshll.u32 %s214_s5, 3  ;;  %s652_s5 = scalar_lea.hbm %s703_s4, %s397_s22 }
  0x19   : > { %s220_s11 = scalar_lea.vmem %s699_s0, %s400_s6  ;;  %s298_s6 = scalar_lea.sflag [#allocation3], %s210_s14 }
  0x1a   : > { %v468_v4 = vld [vmem:[%s220_s11] sm:$0x3f]   ;;  %p472_p0 = pneg %p471_p13  ;;  %s473_s8 = sshll.u32 %s552_s18, 4  ;;  %s474_s8 = int_to_ptr.vmem [resolvable:$false] %s473_s8 }
  0x1b   : > { %v236_v5 = vsel %vm234_vm1, %v468_v4, 0  ;;  %s475_s9 = scalar_lea.vmem %s474_s8, 256  ;;  %p476_p1 = scmp.lt.s32.totalorder %s654_s26, %s474_s8 }
  0x1c   : > { %404 = vmatpush3.bf16.msra.mxu0 %v236_v5  ;;  %p477_p2 = scmp.lt.s32.totalorder %s475_s9, %s469_s7 }
  0x1e   : > { %p478_p3 = por %p477_p2, %p476_p1 }
  0x1f   : > { %406 = vmatmul.mubr.msk.bf16.vlgmr.msra.gmra.mrb[0].mxu0 %vm230_vm2, %v222_v6 }
  0x20   : > { %p479_p5 = pnand %p478_p3, %p472_p0 }
  0x90   : > { %v282_v7 = vpop.permute.xlu0 %281 }
  0x94   : > { %v289_v11 = vpop.permute.xlu0 %288 }
  0xf2   : > { %v272_v8 = vpop.f32.mrb[0].mxu0 }
  0xf3   : > { %v284_v9 = vmul.f32 %v282_v7, %v272_v8  ;;  %v407_v10 = vpop.f32.mrb[1].mxu0 }
  0xf4   : > { %v275_v12 = vpop.f32.mrb[2].mxu0 }
  0xf5   : > { %v291_v13 = vadd.f32 %v289_v11, %v284_v9  ;;  %v408_v14 = vpop.f32.mrb[3].mxu0 }
  0xf7   : > { %vm292_vm3 = vcmp.ge.f32.partialorder %v291_v13, 0.0  ;;  %v293_v15 = vmul.f32 0.2, %v291_v13 }
  0xf9   : > { %v294_v16 = vsel %vm292_vm3, %v291_v13, %v293_v15 }
  0xfa   : > { %296 = vst.msk [vmem:[%s212_s24] sm:$0xff] %vm295_vm4, %v294_v16 }
  0xfb   : > { %482 = shalt.err (!%p479_p5)
}
  0xfc   : > { %s483_s10 = scalar_lea.hbm %s652_s5, 128  ;;  %s487_s13 = scalar_lea.hbm %s703_s4, 256 }
  0xfd   : > { %p484_p6 = scmp.ne.s32.totalorder %s652_s5, %s483_s10  ;;  %p488_p10 = scmp.lt.u32.totalorder %s652_s5, %s703_s4 }
  0xfe   : > { %p489_p11 = scmp.lt.u32.totalorder %s487_s13, %s483_s10  ;;  %p491_p13 = scmp.lt.u32.totalorder %s483_s10, %s652_s5 }
  0xff   : > { %p485_p7 = pnand %p484_p6, %p618_p4 }
 0x100   : > { %p490_p12 = por %p489_p11, %p488_p10 }
 0x101   : > { %p486_p9 = pneg %p485_p7 }
 0x102   : > { %p492_p0 = por %p491_p13, %p490_p12 }
 0x104   : > { %p493_p1 = pnand %p492_p0, %p486_p9 }
 0x106   : > { %496 = shalt.err (!%p493_p1)
}
 0x107   : > { %409 = dma.vmem_to_hbm [thread:$0]  (%p618_p4), %s654_s26, 128, %s652_s5, %s298_s6  }
 0x108 PF: > { %p415_p2 = scmp.ge.s32.totalorder %s547_s20, 2  ;;  %s324_s22 = sand.u32 1, %s527_s15  }
 0x109   : > { %s325_s24 = scalar_lea.sflag [#allocation3], %s324_s22 }
 0x10a   : > { %p412_p3 = pnand %p415_p2, %p625_p8 }
 0x10c   : > { %522 = dma.done.wait (!%p412_p3), %s325_s24, 128  }
 0x10d   : > { %524 = vsyncadd (!%p412_p3), %s325_s24, 4294967168  ;;  %s17_s20 = sadd.s32 1, %s547_s20   ;;  %s706_s15 = smov %s531_s16 }
 0x10e   : > { %p14_p5 = scmp.ge.s32.totalorder %s17_s20, 4   ;;  %s707_s16 = smov %s535_s17 }
 0x10f   : > { %s708_s17 = smov %s631_s28  ;;  %s709_s18 = smov %s543_s19 }
 0x110   : > { %s710_s19 = smov %s712_s23  ;;  %16 = sbr.rel (!%p14_p5) target bundleno = 4 (0x4), region = 71 }
 0x117   :  { %330 = vsyncpa [#allocation3], 1 }
 0x118   :  { %332 = vsyncpa [#allocation3 + $0x1], 1 }

</bundles_post_ra>
